<compile_context>
chip_gen: v7x
topology: tpu7x:2x2x1
jax: 0.10.0
libtpu: 0.0.40
codegen_flags: <defaults>
</compile_context>

<pallas_src>
import math
import numpy as np
import jax
import jax.numpy as jnp
from jax import lax
from jax.experimental import pallas as pl
from jax.experimental.pallas import tpu as pltpu

EPS = 1e-5  # nn.BatchNorm2d default eps


def _round_up(x, m):
    return ((x + m - 1) // m) * m


# ------------------------- Pallas kernel -------------------------

def make_conv_stats_kernel(tap_shifts, cin, lout, kpad):
    """5x5 conv as ONE fused-K MXU matmul on a lane-flattened padded image,
    fused with the per-channel sum / sum-of-squares epilogue (masked to valid
    output lanes) needed for BatchNorm batch statistics."""
    k_used = len(tap_shifts) * cin

    def kernel(x_ref, w_ref, mask_ref, y_ref, stats_ref, xst_ref):
        # x_ref:     (1, Cin, Lx)    bf16  padded input, spatial flattened to lanes
        # w_ref:     (Cout, Kpad)    bf16  merged kernel, taps folded into K
        # mask_ref:  (1, Lout)       f32   1.0 on valid output lanes, 0.0 on garbage
        # y_ref:     (1, Cout, Lout) f32   conv output (lane-dense padded layout)
        # stats_ref: (1, Cout, 2)    f32   packed [sum, sum-of-squares] per channel
        # xst_ref:   (Kpad, Lout)    f32   scratch: stacked lane-shifted windows
        x = x_ref[0].astype(jnp.float32)              # single upcast of resident copy
        for t, s in enumerate(tap_shifts):            # static unroll, 25 windows
            xst_ref[pl.ds(t * cin, cin), :] = x[:, s:s + lout]
        if kpad > k_used:                              # zero the K padding rows
            xst_ref[pl.ds(k_used, kpad - k_used), :] = jnp.zeros(
                (kpad - k_used, lout), jnp.float32)

        # one fused-K matmul: (Cout, Kpad) @ (Kpad, Lout), f32 accumulation
        acc = jnp.dot(w_ref[...], xst_ref[...].astype(jnp.bfloat16),
                      preferred_element_type=jnp.float32)      # (Cout, Lout)

        # BN batch-stats epilogue from the same f32 values that get stored to y
        # (garbage halo / pad-to-128 lanes excluded).
        masked = acc * mask_ref[...]
        stats_ref[0, :, pl.ds(0, 1)] = jnp.sum(masked, axis=1, keepdims=True)
        stats_ref[0, :, pl.ds(1, 1)] = jnp.sum(masked * acc, axis=1, keepdims=True)
        y_ref[0] = acc

    return kernel


# ------------------------- glue (plain JAX) -------------------------

def merge_kernel_mask(kd, k_max, op_alphas):
    """get_merge_kernel(): per-(kh,kw) sum of alphas whose dilated-k pattern hits it."""
    mask = np.zeros((k_max, k_max), np.float32)
    for (k, d), a in zip(kd, op_alphas):
        tmp_ks = (k - 1) * d + 1
        start = (k_max - tmp_ks) // 2
        end = k_max - start
        mask[start:end:d, start:end:d] += a
    return jnp.asarray(mask)


def conv_bn_act_search_forward(x_nchw, weight_oihw, gamma, beta, kd, stride=1):
    # TODO(synk): stride>1 / group>1 / conv-bias paths are not implemented
    # (they are off in the default ConvBNAct_search config).
    assert stride == 1 and x_nchw.ndim == 4
    Cout, _, k_max, _ = weight_oihw.shape
    N, Cin, H, W = x_nchw.shape

    # norm_arch_parameters(self.kd) -> uniform op alphas; single candidate_ch
    # -> ch_alphas=[1.0], deal_merge_kernel_cout skipped, bias=None.
    op_alphas = [1.0 / len(kd)] * len(kd)
    merged_w = weight_oihw * merge_kernel_mask(kd, k_max, op_alphas)[None, None]
    if Cin != merged_w.shape[1]:
        merged_w = merged_w[:, :Cin, :, :]
    pad = (k_max - 1) // 2

    Hp, Wp = H + 2 * pad, W + 2 * pad
    Ho, Wo = Hp - k_max + 1, Wp - k_max + 1
    KK = k_max * k_max

    # Lane-flattened padded image: lane q = ih*Wp + iw.  Output (ho,wo) lives at
    # q = ho*Wp + wo and tap (kh,kw) reads lane q + kh*Wp + kw, so each tap is a
    # static lane-offset window — no im2col buffer in HBM.
    LOUT = _round_up(Ho * Wp, 128)                 # lane-dense output width
    max_shift = (k_max - 1) * Wp + (k_max - 1)
    extra_rows = max(0, -(-(max_shift + LOUT - Hp * Wp) // Wp))
    Lx = (Hp + extra_rows) * Wp

    # single pad straight into the final (N, Cin, Lx) bf16 layout
    x_flat = jnp.pad(
        x_nchw.astype(jnp.bfloat16),
        ((0, 0), (0, 0), (pad, pad + extra_rows), (pad, pad))).reshape(N, Cin, Lx)

    # merged weights as ONE (Cout, Kpad) bf16 slab; column (kh*k_max+kw)*Cin + c
    # multiplies the window of channel c shifted by kh*Wp + kw.
    KPAD = _round_up(KK * Cin, 128)
    w2d = jnp.transpose(merged_w, (0, 2, 3, 1)).reshape(Cout, KK * Cin)
    w2d = jnp.pad(w2d, ((0, 0), (0, KPAD - KK * Cin))).astype(jnp.bfloat16)
    tap_shifts = [kh * Wp + kw for kh in range(k_max) for kw in range(k_max)]

    # validity mask over flattened output lanes (right/bottom halo + pad-to-128 tail)
    q = np.arange(LOUT)
    valid = ((q // Wp) < Ho) & ((q % Wp) < Wo)
    lane_mask = jnp.asarray(valid[None, :].astype(np.float32))     # (1, LOUT)

    flops = 2 * N * KK * Cin * Cout * Ho * Wo
    bytes_accessed = (N * Cin * Lx * 2 + Cout * KPAD * 2 + LOUT * 4
                      + N * Cout * LOUT * 4 + N * Cout * 2 * 4)

    conv_kernel = make_conv_stats_kernel(tap_shifts, Cin, LOUT, KPAD)
    y, stats = pl.pallas_call(
        conv_kernel,
        # One batch element per step: two "parallel" steps feed both v7x
        # TensorCores; on single-TC v5e/v6e the extra step costs ~0.35 us only.
        grid=(N,),
        in_specs=[
            pl.BlockSpec((1, Cin, Lx), lambda b: (b, 0, 0)),
            pl.BlockSpec((Cout, KPAD), lambda b: (0, 0)),
            pl.BlockSpec((1, LOUT), lambda b: (0, 0)),
        ],
        out_specs=(
            pl.BlockSpec((1, Cout, LOUT), lambda b: (b, 0, 0)),
            pl.BlockSpec((1, Cout, 2), lambda b: (b, 0, 0)),
        ),
        out_shape=(
            jax.ShapeDtypeStruct((N, Cout, LOUT), jnp.float32),
            jax.ShapeDtypeStruct((N, Cout, 2), jnp.float32),
        ),
        scratch_shapes=[pltpu.VMEM((KPAD, LOUT), jnp.float32)],
        compiler_params=pltpu.CompilerParams(
            dimension_semantics=("parallel",),
            vmem_limit_bytes=32 * 1024 * 1024),     # also safe on v7x (64 MiB VMEM)
        cost_estimate=pl.CostEstimate(flops=flops, transcendentals=0,
                                      bytes_accessed=bytes_accessed),
    )(x_flat, w2d, lane_mask)

    # --- global f32 batch statistics -> per-channel affine scale/shift ---
    count = float(N * Ho * Wo)
    mean = jnp.sum(stats[:, :, 0], axis=0) / count                 # (Cout,)
    var = jnp.sum(stats[:, :, 1], axis=0) / count - mean * mean    # biased, BN(train)
    inv = lax.rsqrt(var + EPS)
    scale = (gamma * inv)[None, :, None]
    shift = (beta - mean * gamma * inv)[None, :, None]

    # BN apply + ReLU + de-halo slice as plain jnp -> XLA fuses into one pass.
    out_full = jnp.maximum(y * scale + shift, 0.0)
    # lanes q = ho*Wp + wo map straight back to NCHW; garbage halo/tail lanes are
    # dropped here (never consume out_full without this slice).
    out = out_full[:, :, :Ho * Wp].reshape(N, Cout, Ho, Wp)[:, :, :, :Wo]
    return out


# ------------------------- driver -------------------------

if __name__ == "__main__":
    # module config (defaults)
    kd = [(1, 1), (3, 1), (5, 1), (3, 2)]
    k_max = max((k - 1) * d + 1 for k, d in kd)        # 5
    in_channel, out_channel = 4, 8
    N, H, W = 2, 16, 16

    # deterministic parameter init (shapes from __init__)
    key = jax.random.PRNGKey(0)
    kwt, kx = jax.random.split(key)
    fan_in = in_channel * k_max * k_max
    std = math.sqrt(2.0 / fan_in)                      # kaiming_normal_ (fan_in)
    weight = jax.random.normal(
        kwt, (out_channel, in_channel, k_max, k_max), jnp.float32) * std
    gamma = jnp.ones((out_channel,), jnp.float32)      # BN affine init
    beta = jnp.zeros((out_channel,), jnp.float32)
    x = jax.random.normal(kx, (N, in_channel, H, W), jnp.float32)

    out = conv_bn_act_search_forward(x, weight, gamma, beta, kd, stride=1)
    out = jax.block_until_ready(out)

    # reference: plain XLA conv + BatchNorm(train, biased var) + ReLU
    mask = merge_kernel_mask(kd, k_max, [1.0 / len(kd)] * len(kd))
    merged_w = weight * mask[None, None]
    ref = lax.conv_general_dilated(
        x, merged_w, window_strides=(1, 1), padding=((2, 2), (2, 2)),
        dimension_numbers=("NCHW", "OIHW", "NCHW"),
        precision=lax.Precision.HIGHEST)
    mean = ref.mean(axis=(0, 2, 3), keepdims=True)
    var = ((ref - mean) ** 2).mean(axis=(0, 2, 3), keepdims=True)
    ref = jnp.maximum((ref - mean) / jnp.sqrt(var + EPS)
                      * gamma.reshape(1, -1, 1, 1) + beta.reshape(1, -1, 1, 1), 0.0)

    # bf16 MXU inputs/weights vs f32 reference -> slightly loose tolerance
    np.testing.assert_allclose(np.asarray(out), np.asarray(ref),
                               rtol=2e-2, atol=2e-2)
    assert out.shape == (N, out_channel, H, W)
    print("KERNEL_OK")
</pallas_src>

<mosaic_0001>
module attributes {stable_mosaic.version = 11 : i64} {
  func.func @kernel(%arg0: i32, %arg1: memref<1x4x480xbf16, #tpu.memory_space<vmem>>, %arg2: memref<8x128xbf16, #tpu.memory_space<vmem>>, %arg3: memref<1x384xf32, #tpu.memory_space<vmem>>, %arg4: memref<1x8x384xf32, #tpu.memory_space<vmem>>, %arg5: memref<1x8x2xf32, #tpu.memory_space<vmem>>, %arg6: memref<128x384xf32, #tpu.memory_space<vmem>>) attributes {dimension_semantics = [#tpu.dimension_semantics<parallel>], iteration_bounds = array<i64: 2>, scalar_prefetch = 0 : i64, scratch_operands = 1 : i64, tpu.core_type = #tpu.core_type<tc>, window_params = [{transform_indices = @transform_0, window_bounds = array<i64: 1, 4, 480>}, {pipeline_mode = #tpu.pipeline_mode<synchronous>, transform_indices = @transform_1, window_bounds = array<i64: 8, 128>}, {pipeline_mode = #tpu.pipeline_mode<synchronous>, transform_indices = @transform_2, window_bounds = array<i64: 1, 384>}, {transform_indices = @transform_3, window_bounds = array<i64: 1, 8, 384>}, {transform_indices = @transform_4, window_bounds = array<i64: 1, 8, 2>}]} {
    %c0 = arith.constant 0 : index
    %c0_0 = arith.constant 0 : index
    %c0_1 = arith.constant 0 : index
    %0 = vector.load %arg1[%c0, %c0_0, %c0_1] : memref<1x4x480xbf16, #tpu.memory_space<vmem>>, vector<1x4x480xbf16>
    %1 = vector.shape_cast %0 : vector<1x4x480xbf16> to vector<4x480xbf16>
    %2 = arith.extf %1 : vector<4x480xbf16> to vector<4x480xf32>
    %3 = vector.extract_strided_slice %2 {offsets = [0, 0], sizes = [4, 384], strides = [1, 1]} : vector<4x480xf32> to vector<4x384xf32>
    %c0_2 = arith.constant 0 : index
    %c0_3 = arith.constant 0 : index
    %4 = vector.load %arg6[%c0_2, %c0_3] : memref<128x384xf32, #tpu.memory_space<vmem>>, vector<4x384xf32>
    tpu.vector_store %arg6[%c0_2, %c0_3], %3 {strides = array<i32>} : memref<128x384xf32, #tpu.memory_space<vmem>>, vector<4x384xf32>,
    %5 = vector.extract_strided_slice %2 {offsets = [0, 1], sizes = [4, 384], strides = [1, 1]} : vector<4x480xf32> to vector<4x384xf32>
    %c4 = arith.constant 4 : index
    %c0_4 = arith.constant 0 : index
    %6 = vector.load %arg6[%c4, %c0_4] : memref<128x384xf32, #tpu.memory_space<vmem>>, vector<4x384xf32>
    tpu.vector_store %arg6[%c4, %c0_4], %5 {strides = array<i32>} : memref<128x384xf32, #tpu.memory_space<vmem>>, vector<4x384xf32>,
    %7 = vector.extract_strided_slice %2 {offsets = [0, 2], sizes = [4, 384], strides = [1, 1]} : vector<4x480xf32> to vector<4x384xf32>
    %c8 = arith.constant 8 : index
    %c0_5 = arith.constant 0 : index
    %8 = vector.load %arg6[%c8, %c0_5] : memref<128x384xf32, #tpu.memory_space<vmem>>, vector<4x384xf32>
    tpu.vector_store %arg6[%c8, %c0_5], %7 {strides = array<i32>} : memref<128x384xf32, #tpu.memory_space<vmem>>, vector<4x384xf32>,
    %9 = vector.extract_strided_slice %2 {offsets = [0, 3], sizes = [4, 384], strides = [1, 1]} : vector<4x480xf32> to vector<4x384xf32>
    %c12 = arith.constant 12 : index
    %c0_6 = arith.constant 0 : index
    %10 = vector.load %arg6[%c12, %c0_6] : memref<128x384xf32, #tpu.memory_space<vmem>>, vector<4x384xf32>
    tpu.vector_store %arg6[%c12, %c0_6], %9 {strides = array<i32>} : memref<128x384xf32, #tpu.memory_space<vmem>>, vector<4x384xf32>,
    %11 = vector.extract_strided_slice %2 {offsets = [0, 4], sizes = [4, 384], strides = [1, 1]} : vector<4x480xf32> to vector<4x384xf32>
    %c16 = arith.constant 16 : index
    %c0_7 = arith.constant 0 : index
    %12 = vector.load %arg6[%c16, %c0_7] : memref<128x384xf32, #tpu.memory_space<vmem>>, vector<4x384xf32>
    tpu.vector_store %arg6[%c16, %c0_7], %11 {strides = array<i32>} : memref<128x384xf32, #tpu.memory_space<vmem>>, vector<4x384xf32>,
    %13 = vector.extract_strided_slice %2 {offsets = [0, 20], sizes = [4, 384], strides = [1, 1]} : vector<4x480xf32> to vector<4x384xf32>
    %c20 = arith.constant 20 : index
    %c0_8 = arith.constant 0 : index
    %14 = vector.load %arg6[%c20, %c0_8] : memref<128x384xf32, #tpu.memory_space<vmem>>, vector<4x384xf32>
    tpu.vector_store %arg6[%c20, %c0_8], %13 {strides = array<i32>} : memref<128x384xf32, #tpu.memory_space<vmem>>, vector<4x384xf32>,
    %15 = vector.extract_strided_slice %2 {offsets = [0, 21], sizes = [4, 384], strides = [1, 1]} : vector<4x480xf32> to vector<4x384xf32>
    %c24 = arith.constant 24 : index
    %c0_9 = arith.constant 0 : index
    %16 = vector.load %arg6[%c24, %c0_9] : memref<128x384xf32, #tpu.memory_space<vmem>>, vector<4x384xf32>
    tpu.vector_store %arg6[%c24, %c0_9], %15 {strides = array<i32>} : memref<128x384xf32, #tpu.memory_space<vmem>>, vector<4x384xf32>,
    %17 = vector.extract_strided_slice %2 {offsets = [0, 22], sizes = [4, 384], strides = [1, 1]} : vector<4x480xf32> to vector<4x384xf32>
    %c28 = arith.constant 28 : index
    %c0_10 = arith.constant 0 : index
    %18 = vector.load %arg6[%c28, %c0_10] : memref<128x384xf32, #tpu.memory_space<vmem>>, vector<4x384xf32>
    tpu.vector_store %arg6[%c28, %c0_10], %17 {strides = array<i32>} : memref<128x384xf32, #tpu.memory_space<vmem>>, vector<4x384xf32>,
    %19 = vector.extract_strided_slice %2 {offsets = [0, 23], sizes = [4, 384], strides = [1, 1]} : vector<4x480xf32> to vector<4x384xf32>
    %c32 = arith.constant 32 : index
    %c0_11 = arith.constant 0 : index
    %20 = vector.load %arg6[%c32, %c0_11] : memref<128x384xf32, #tpu.memory_space<vmem>>, vector<4x384xf32>
    tpu.vector_store %arg6[%c32, %c0_11], %19 {strides = array<i32>} : memref<128x384xf32, #tpu.memory_space<vmem>>, vector<4x384xf32>,
    %21 = vector.extract_strided_slice %2 {offsets = [0, 24], sizes = [4, 384], strides = [1, 1]} : vector<4x480xf32> to vector<4x384xf32>
    %c36 = arith.constant 36 : index
    %c0_12 = arith.constant 0 : index
    %22 = vector.load %arg6[%c36, %c0_12] : memref<128x384xf32, #tpu.memory_space<vmem>>, vector<4x384xf32>
    tpu.vector_store %arg6[%c36, %c0_12], %21 {strides = array<i32>} : memref<128x384xf32, #tpu.memory_space<vmem>>, vector<4x384xf32>,
    %23 = vector.extract_strided_slice %2 {offsets = [0, 40], sizes = [4, 384], strides = [1, 1]} : vector<4x480xf32> to vector<4x384xf32>
    %c40 = arith.constant 40 : index
    %c0_13 = arith.constant 0 : index
    %24 = vector.load %arg6[%c40, %c0_13] : memref<128x384xf32, #tpu.memory_space<vmem>>, vector<4x384xf32>
    tpu.vector_store %arg6[%c40, %c0_13], %23 {strides = array<i32>} : memref<128x384xf32, #tpu.memory_space<vmem>>, vector<4x384xf32>,
    %25 = vector.extract_strided_slice %2 {offsets = [0, 41], sizes = [4, 384], strides = [1, 1]} : vector<4x480xf32> to vector<4x384xf32>
    %c44 = arith.constant 44 : index
    %c0_14 = arith.constant 0 : index
    %26 = vector.load %arg6[%c44, %c0_14] : memref<128x384xf32, #tpu.memory_space<vmem>>, vector<4x384xf32>
    tpu.vector_store %arg6[%c44, %c0_14], %25 {strides = array<i32>} : memref<128x384xf32, #tpu.memory_space<vmem>>, vector<4x384xf32>,
    %27 = vector.extract_strided_slice %2 {offsets = [0, 42], sizes = [4, 384], strides = [1, 1]} : vector<4x480xf32> to vector<4x384xf32>
    %c48 = arith.constant 48 : index
    %c0_15 = arith.constant 0 : index
    %28 = vector.load %arg6[%c48, %c0_15] : memref<128x384xf32, #tpu.memory_space<vmem>>, vector<4x384xf32>
    tpu.vector_store %arg6[%c48, %c0_15], %27 {strides = array<i32>} : memref<128x384xf32, #tpu.memory_space<vmem>>, vector<4x384xf32>,
    %29 = vector.extract_strided_slice %2 {offsets = [0, 43], sizes = [4, 384], strides = [1, 1]} : vector<4x480xf32> to vector<4x384xf32>
    %c52 = arith.constant 52 : index
    %c0_16 = arith.constant 0 : index
    %30 = vector.load %arg6[%c52, %c0_16] : memref<128x384xf32, #tpu.memory_space<vmem>>, vector<4x384xf32>
    tpu.vector_store %arg6[%c52, %c0_16], %29 {strides = array<i32>} : memref<128x384xf32, #tpu.memory_space<vmem>>, vector<4x384xf32>,
    %31 = vector.extract_strided_slice %2 {offsets = [0, 44], sizes = [4, 384], strides = [1, 1]} : vector<4x480xf32> to vector<4x384xf32>
    %c56 = arith.constant 56 : index
    %c0_17 = arith.constant 0 : index
    %32 = vector.load %arg6[%c56, %c0_17] : memref<128x384xf32, #tpu.memory_space<vmem>>, vector<4x384xf32>
    tpu.vector_store %arg6[%c56, %c0_17], %31 {strides = array<i32>} : memref<128x384xf32, #tpu.memory_space<vmem>>, vector<4x384xf32>,
    %33 = vector.extract_strided_slice %2 {offsets = [0, 60], sizes = [4, 384], strides = [1, 1]} : vector<4x480xf32> to vector<4x384xf32>
    %c60 = arith.constant 60 : index
    %c0_18 = arith.constant 0 : index
    %34 = vector.load %arg6[%c60, %c0_18] : memref<128x384xf32, #tpu.memory_space<vmem>>, vector<4x384xf32>
    tpu.vector_store %arg6[%c60, %c0_18], %33 {strides = array<i32>} : memref<128x384xf32, #tpu.memory_space<vmem>>, vector<4x384xf32>,
    %35 = vector.extract_strided_slice %2 {offsets = [0, 61], sizes = [4, 384], strides = [1, 1]} : vector<4x480xf32> to vector<4x384xf32>
    %c64 = arith.constant 64 : index
    %c0_19 = arith.constant 0 : index
    %36 = vector.load %arg6[%c64, %c0_19] : memref<128x384xf32, #tpu.memory_space<vmem>>, vector<4x384xf32>
    tpu.vector_store %arg6[%c64, %c0_19], %35 {strides = array<i32>} : memref<128x384xf32, #tpu.memory_space<vmem>>, vector<4x384xf32>,
    %37 = vector.extract_strided_slice %2 {offsets = [0, 62], sizes = [4, 384], strides = [1, 1]} : vector<4x480xf32> to vector<4x384xf32>
    %c68 = arith.constant 68 : index
    %c0_20 = arith.constant 0 : index
    %38 = vector.load %arg6[%c68, %c0_20] : memref<128x384xf32, #tpu.memory_space<vmem>>, vector<4x384xf32>
    tpu.vector_store %arg6[%c68, %c0_20], %37 {strides = array<i32>} : memref<128x384xf32, #tpu.memory_space<vmem>>, vector<4x384xf32>,
    %39 = vector.extract_strided_slice %2 {offsets = [0, 63], sizes = [4, 384], strides = [1, 1]} : vector<4x480xf32> to vector<4x384xf32>
    %c72 = arith.constant 72 : index
    %c0_21 = arith.constant 0 : index
    %40 = vector.load %arg6[%c72, %c0_21] : memref<128x384xf32, #tpu.memory_space<vmem>>, vector<4x384xf32>
    tpu.vector_store %arg6[%c72, %c0_21], %39 {strides = array<i32>} : memref<128x384xf32, #tpu.memory_space<vmem>>, vector<4x384xf32>,
    %41 = vector.extract_strided_slice %2 {offsets = [0, 64], sizes = [4, 384], strides = [1, 1]} : vector<4x480xf32> to vector<4x384xf32>
    %c76 = arith.constant 76 : index
    %c0_22 = arith.constant 0 : index
    %42 = vector.load %arg6[%c76, %c0_22] : memref<128x384xf32, #tpu.memory_space<vmem>>, vector<4x384xf32>
    tpu.vector_store %arg6[%c76, %c0_22], %41 {strides = array<i32>} : memref<128x384xf32, #tpu.memory_space<vmem>>, vector<4x384xf32>,
    %43 = vector.extract_strided_slice %2 {offsets = [0, 80], sizes = [4, 384], strides = [1, 1]} : vector<4x480xf32> to vector<4x384xf32>
    %c80 = arith.constant 80 : index
    %c0_23 = arith.constant 0 : index
    %44 = vector.load %arg6[%c80, %c0_23] : memref<128x384xf32, #tpu.memory_space<vmem>>, vector<4x384xf32>
    tpu.vector_store %arg6[%c80, %c0_23], %43 {strides = array<i32>} : memref<128x384xf32, #tpu.memory_space<vmem>>, vector<4x384xf32>,
    %45 = vector.extract_strided_slice %2 {offsets = [0, 81], sizes = [4, 384], strides = [1, 1]} : vector<4x480xf32> to vector<4x384xf32>
    %c84 = arith.constant 84 : index
    %c0_24 = arith.constant 0 : index
    %46 = vector.load %arg6[%c84, %c0_24] : memref<128x384xf32, #tpu.memory_space<vmem>>, vector<4x384xf32>
    tpu.vector_store %arg6[%c84, %c0_24], %45 {strides = array<i32>} : memref<128x384xf32, #tpu.memory_space<vmem>>, vector<4x384xf32>,
    %47 = vector.extract_strided_slice %2 {offsets = [0, 82], sizes = [4, 384], strides = [1, 1]} : vector<4x480xf32> to vector<4x384xf32>
    %c88 = arith.constant 88 : index
    %c0_25 = arith.constant 0 : index
    %48 = vector.load %arg6[%c88, %c0_25] : memref<128x384xf32, #tpu.memory_space<vmem>>, vector<4x384xf32>
    tpu.vector_store %arg6[%c88, %c0_25], %47 {strides = array<i32>} : memref<128x384xf32, #tpu.memory_space<vmem>>, vector<4x384xf32>,
    %49 = vector.extract_strided_slice %2 {offsets = [0, 83], sizes = [4, 384], strides = [1, 1]} : vector<4x480xf32> to vector<4x384xf32>
    %c92 = arith.constant 92 : index
    %c0_26 = arith.constant 0 : index
    %50 = vector.load %arg6[%c92, %c0_26] : memref<128x384xf32, #tpu.memory_space<vmem>>, vector<4x384xf32>
    tpu.vector_store %arg6[%c92, %c0_26], %49 {strides = array<i32>} : memref<128x384xf32, #tpu.memory_space<vmem>>, vector<4x384xf32>,
    %51 = vector.extract_strided_slice %2 {offsets = [0, 84], sizes = [4, 384], strides = [1, 1]} : vector<4x480xf32> to vector<4x384xf32>
    %c96 = arith.constant 96 : index
    %c0_27 = arith.constant 0 : index
    %52 = vector.load %arg6[%c96, %c0_27] : memref<128x384xf32, #tpu.memory_space<vmem>>, vector<4x384xf32>
    tpu.vector_store %arg6[%c96, %c0_27], %51 {strides = array<i32>} : memref<128x384xf32, #tpu.memory_space<vmem>>, vector<4x384xf32>,
    %cst = arith.constant 0.000000e+00 : f32
    %53 = vector.broadcast %cst : f32 to vector<28x384xf32>
    %c100 = arith.constant 100 : index
    %c0_28 = arith.constant 0 : index
    %54 = vector.load %arg6[%c100, %c0_28] : memref<128x384xf32, #tpu.memory_space<vmem>>, vector<28x384xf32>
    tpu.vector_store %arg6[%c100, %c0_28], %53 {strides = array<i32>} : memref<128x384xf32, #tpu.memory_space<vmem>>, vector<28x384xf32>,
    %c0_29 = arith.constant 0 : index
    %c0_30 = arith.constant 0 : index
    %55 = vector.load %arg2[%c0_29, %c0_30] : memref<8x128xbf16, #tpu.memory_space<vmem>>, vector<8x128xbf16>
    %c0_31 = arith.constant 0 : index
    %c0_32 = arith.constant 0 : index
    %56 = vector.load %arg6[%c0_31, %c0_32] : memref<128x384xf32, #tpu.memory_space<vmem>>, vector<128x384xf32>
    %57 = arith.truncf %56 : vector<128x384xf32> to vector<128x384xbf16>
    %cst_33 = arith.constant dense<0.000000e+00> : vector<8x384xf32>
    %58 = tpu.matmul %55, %57, %cst_33 {dimension_numbers = #tpu.dot_dimension_numbers<[1], [0], [0], [1], [0, 0, 1, 1], [], []>} : vector<8x128xbf16>, vector<128x384xbf16>, vector<8x384xf32> -> vector<8x384xf32>
    %c0_34 = arith.constant 0 : index
    %c0_35 = arith.constant 0 : index
    %59 = vector.load %arg3[%c0_34, %c0_35] : memref<1x384xf32, #tpu.memory_space<vmem>>, vector<1x384xf32>
    %60 = vector.broadcast %59 : vector<1x384xf32> to vector<8x384xf32>
    %61 = arith.mulf %58, %60 : vector<8x384xf32>
    %cst_36 = arith.constant dense<0.000000e+00> : vector<8xf32>
    %62 = vector.multi_reduction <add>, %61, %cst_36 [1] : vector<8x384xf32> to vector<8xf32>
    %63 = vector.shape_cast %62 : vector<8xf32> to vector<8x1xf32>
    %c0_37 = arith.constant 0 : index
    %c0_38 = arith.constant 0 : index
    %c0_39 = arith.constant 0 : index
    %64 = vector.load %arg5[%c0_37, %c0_38, %c0_39] : memref<1x8x2xf32, #tpu.memory_space<vmem>>, vector<1x8x1xf32>
    %65 = vector.shape_cast %64 : vector<1x8x1xf32> to vector<8x1xf32>
    %66 = vector.shape_cast %63 : vector<8x1xf32> to vector<1x8x1xf32>
    tpu.vector_store %arg5[%c0_37, %c0_38, %c0_39], %66 {strides = array<i32>} : memref<1x8x2xf32, #tpu.memory_space<vmem>>, vector<1x8x1xf32>,
    %67 = arith.mulf %61, %58 : vector<8x384xf32>
    %cst_40 = arith.constant dense<0.000000e+00> : vector<8xf32>
    %68 = vector.multi_reduction <add>, %67, %cst_40 [1] : vector<8x384xf32> to vector<8xf32>
    %69 = vector.shape_cast %68 : vector<8xf32> to vector<8x1xf32>
    %c0_41 = arith.constant 0 : index
    %c0_42 = arith.constant 0 : index
    %c1 = arith.constant 1 : index
    %70 = vector.load %arg5[%c0_41, %c0_42, %c1] : memref<1x8x2xf32, #tpu.memory_space<vmem>>, vector<1x8x1xf32>
    %71 = vector.shape_cast %70 : vector<1x8x1xf32> to vector<8x1xf32>
    %72 = vector.shape_cast %69 : vector<8x1xf32> to vector<1x8x1xf32>
    tpu.vector_store %arg5[%c0_41, %c0_42, %c1], %72 {strides = array<i32>} : memref<1x8x2xf32, #tpu.memory_space<vmem>>, vector<1x8x1xf32>,
    %c0_43 = arith.constant 0 : index
    %c0_44 = arith.constant 0 : index
    %c0_45 = arith.constant 0 : index
    %73 = vector.load %arg4[%c0_43, %c0_44, %c0_45] : memref<1x8x384xf32, #tpu.memory_space<vmem>>, vector<1x8x384xf32>
    %74 = vector.shape_cast %73 : vector<1x8x384xf32> to vector<8x384xf32>
    %75 = vector.shape_cast %58 : vector<8x384xf32> to vector<1x8x384xf32>
    tpu.vector_store %arg4[%c0_43, %c0_44, %c0_45], %75 {strides = array<i32>} : memref<1x8x384xf32, #tpu.memory_space<vmem>>, vector<1x8x384xf32>,
    return
  }
  func.func @transform_0(%arg0: i32) -> (i32, i32, i32) {
    %c0_i32 = arith.constant 0 : i32
    %c0_i32_0 = arith.constant 0 : i32
    %c0_i32_1 = arith.constant 0 : i32
    return %arg0, %c0_i32, %c0_i32_0 : i32, i32, i32
  }
  func.func @transform_1(%arg0: i32) -> (i32, i32) {
    %c0_i32 = arith.constant 0 : i32
    %c0_i32_0 = arith.constant 0 : i32
    %c0_i32_1 = arith.constant 0 : i32
    return %c0_i32, %c0_i32_0 : i32, i32
  }
  func.func @transform_2(%arg0: i32) -> (i32, i32) {
    %c0_i32 = arith.constant 0 : i32
    %c0_i32_0 = arith.constant 0 : i32
    %c0_i32_1 = arith.constant 0 : i32
    return %c0_i32, %c0_i32_0 : i32, i32
  }
  func.func @transform_3(%arg0: i32) -> (i32, i32, i32) {
    %c0_i32 = arith.constant 0 : i32
    %c0_i32_0 = arith.constant 0 : i32
    %c0_i32_1 = arith.constant 0 : i32
    return %arg0, %c0_i32, %c0_i32_0 : i32, i32, i32
  }
  func.func @transform_4(%arg0: i32) -> (i32, i32, i32) {
    %c0_i32 = arith.constant 0 : i32
    %c0_i32_0 = arith.constant 0 : i32
    %c0_i32_1 = arith.constant 0 : i32
    return %arg0, %c0_i32, %c0_i32_0 : i32, i32, i32
  }
}

</mosaic_0001>

<bundles_post_ra>
// kernel: tpu_custom_call.1
= control target key start
LH: loop header
LB: loop body
LE: loop exit
PB: predicated region body
PF: predicated region fallthrough
CT: control target
= control target key end

     0   :  { %10 = vsyncpa [#allocation4], 0  ;;  %s1922_s0 = inlined_call_operand.hbm [shape: bf16[2,4,480], index: 0, kind: input, shape index: {}]   ;;  %s1923_s1 = inlined_call_operand.hbm [shape: bf16[8,128], index: 1, kind: input, shape index: {}]   ;;  %s1924_s2 = inlined_call_operand.vmem [shape: f32[1,384], index: 2, kind: input, shape index: {}]   ;;  %s1925_s3 = inlined_call_operand.hbm [shape: f32[2,8,384], index: 3, kind: output, shape index: {0}]   ;;  %s1926_s4 = inlined_call_operand.vmem [shape: f32[2,8,2], index: 4, kind: output, shape index: {1}]  }
   0x1   :  { %12 = vsyncpa [#allocation4 + $0x1], 0 }
   0x2   :  { %13 = vsyncpa [#allocation7], 0 }
   0x3   :  { %14 = vsyncpa [#allocation5], 0 }
   0x4   :  { %16 = vsyncpa [#allocation5 + $0x1], 0  ;;  %s1565_s15 = smov 0   ;;  %s1567_s16 = smov 0  }
   0x5   :  { %s1569_s17 = smov 0   ;;  %s1571_s18 = smov 0  }
   0x6 LB: > { %s1586_s19 = sadd.s32 4294967295, %s1507_s18   ;;  %s1014_s20 = sadd.s32 4294967294, %s1507_s18   ;;  %s1507_s18 = sphi %s1571_s18, %s1950_s18   ;;  %s1503_s17 = sphi %s1569_s17, %s1949_s17   ;;  %s1499_s16 = sphi %s1567_s16, %s1948_s16   ;;  %s1495_s15 = sphi %s1565_s15, %s1947_s15  }
   0x7   : > { %p42_p0 = scmp.ne.s32.totalorder %s1499_s16, %s1495_s15  ;;  %p1927_p1 = scmp.eq.s32.totalorder %s1586_s19, 0 }
   0x8   : > { %p114_p3 = scmp.eq.s32.totalorder %s1014_s20, 1  ;;  %p1015_p5 = scmp.ge.s32.totalorder %s1507_s18, 1 }
   0x9   : > { %p1595_p4 = por %p1927_p1, %p42_p0  ;;  %p147_p7 = scmp.lt.s32.totalorder %s1507_s18, 3 }
   0xa   : > { %p1600_p6 = por %p114_p3, %p42_p0  ;;  %s1509_s24 = smov [#allocation6]  }
   0xb   : > { %s1930_s21 = scalar_select %p1595_p4, 1, 0 }
   0xc   : > { %s1931_s22 = scalar_select %p1600_p6, 1, 0 }
   0xd   : > { %p1605_p8 = pnand %p1015_p5, %p147_p7  ;;  %s160_s25 = sshll.u32 %s1509_s24, 4  ;;  %s161_s25 = int_to_ptr.vmem [resolvable:$true] %s160_s25 }
   0xe   : > { %s1613_s26 = sadd.s32 1, %s1507_s18   ;;  %s29_s30 = sadd.s32 1, %s1503_s17 }
   0xf   : > { %s1932_s23 = scalar_select %p1605_p8, 1, 0 }
  0x10   : > { %p1068_p10 = pneg %p1605_p8  ;;  %s26_s28 = ssub.s32 %s1507_s18, %s1613_s26 }
  0x11   : > { %p1623_p12 = scmp.eq.s32.totalorder %s26_s28, 0  ;;  %s1379_s7 = scalar_lea.hbm %s1923_s1, 64 }
  0x12   : > { %p1617_p11 = pnand %p1068_p10, %p1927_p1  ;;  %p1380_p0 = scmp.ne.s32.totalorder %s1923_s1, %s1379_s7 }
  0x13   : > { %s1934_s29 = scalar_select %p1623_p12, 1, 0 }
  0x14   : > { %p1381_p3 = pneg %p1617_p11  ;;  %p1386_p10 = scmp.lt.u32.totalorder %s1379_s7, %s1923_s1 }
  0x16   : > { %p1382_p5 = pnand %p1381_p3, %p1380_p0 }
  0x18   : > { %p1383_p7 = pneg %p1382_p5 }
  0x1a   : > { %p1388_p9 = pnand %p1386_p10, %p1383_p7 }
  0x1c   : > { %1391 = shalt.err (!%p1388_p9)
}
  0x1d   : > { %s1392_s12 = scalar_lea.vmem %s161_s25, 64  ;;  %p1400_p6 = scmp.lt.s32.totalorder %s161_s25, %s161_s25 }
  0x1e   : > { %p1393_p1 = scmp.ne.s32.totalorder %s161_s25, %s1392_s12  ;;  %p1401_p4 = scmp.lt.s32.totalorder %s1392_s12, %s1392_s12 }
  0x20   : > { %p1395_p2 = pnand %p1393_p1, %p1381_p3  ;;  %p1402_p8 = por %p1401_p4, %p1400_p6 }
  0x22   : > { %p1396_p13 = pneg %p1395_p2 }
  0x24   : > { %p1403_p12 = pnand %p1402_p8, %p1396_p13 }
  0x26   : > { %1406 = shalt.err (!%p1403_p12)
}
  0x27   : > { %1071 = dma.hbm_to_vmem [thread:$0]  (!%p1617_p11), %s1923_s1, 64, %s161_s25, [#allocation7]  }
  0x28   : > { %p1935_p1 = scmp.ne.s32.totalorder %s1934_s29, 0  ;;  %p37_p2 = scmp.eq.s32.totalorder %s1507_s18, 0 }
  0x29   : > { %p1936_p4 = scmp.ne.s32.totalorder %s1503_s17, %s1499_s16  ;;  %p1937_p6 = scmp.eq.s32.totalorder %s1586_s19, 1 }
  0x2a   : > { %s1649_s20 = scalar_select %p1935_p1, %s1503_s17, %s29_s30  }
  0x2b   : > { %p1657_p8 = por %p1937_p6, %p1936_p4  ;;  %p1081_p9 = scmp.lt.s32.totalorder %s1507_s18, 2 }
  0x2c   : > { %s174_s27 = sand.u32 1, %s1503_s17   ;;  %p1939_p12 = pmov %p1936_p4 }
  0x2d   : > { %s1018_s28 = sshll.u32 %s174_s27, 3  ;;  %s1028_s5 = sshll.u32 %s1507_s18, 7 }
  0x2e   : > { %p38_p13 = por %p37_p2, %p1939_p12  ;;  %s1670_s25 = scalar_lea.hbm %s1922_s0, %s1028_s5 }
  0x2f   : > { %s178_s29 = scalar_lea.vmem [#allocation3], %s1018_s28  ;;  %s175_s9 = scalar_lea.sflag [#allocation4], %s174_s27 }
  0x30   : > { %s186_s30 = sshll.u32 %s178_s29, 4  ;;  %p1672_p11 = pnand %p1081_p9, %p38_p13  ;;  %s1676_s30 = int_to_ptr.vmem [resolvable:$true] %s186_s30 }
  0x31   : > { %s1407_s10 = scalar_lea.hbm %s1670_s25, 128  ;;  %s1412_s13 = scalar_lea.hbm %s1922_s0, 256 }
  0x32   : > { %p1408_p0 = scmp.ne.s32.totalorder %s1670_s25, %s1407_s10  ;;  %p1409_p3 = pneg %p1672_p11 }
  0x33   : > { %p1413_p10 = scmp.lt.u32.totalorder %s1670_s25, %s1922_s0  ;;  %p1414_p1 = scmp.lt.u32.totalorder %s1412_s13, %s1407_s10 }
  0x34   : > { %p1410_p5 = pnand %p1409_p3, %p1408_p0  ;;  %p1416_p4 = scmp.lt.u32.totalorder %s1407_s10, %s1670_s25 }
  0x35   : > { %p1415_p2 = por %p1414_p1, %p1413_p10 }
  0x36   : > { %p1411_p7 = pneg %p1410_p5 }
  0x37   : > { %p1417_p6 = por %p1416_p4, %p1415_p2 }
  0x39   : > { %p1418_p9 = pnand %p1417_p6, %p1411_p7 }
  0x3b   : > { %1421 = shalt.err (!%p1418_p9)
}
  0x3c   : > { %s1422_s27 = scalar_lea.vmem %s1676_s30, 128  ;;  %s1510_s5 = smov [#allocation3]  }
  0x3d   : > { %p1423_p12 = scmp.ne.s32.totalorder %s1676_s30, %s1422_s27  ;;  %s1427_s6 = sshll.u32 %s1510_s5, 4  ;;  %s1428_s6 = int_to_ptr.vmem [resolvable:$false] %s1427_s6 }
  0x3e   : > { %s1429_s7 = scalar_lea.vmem %s1428_s6, 256  ;;  %p1430_p5 = scmp.lt.s32.totalorder %s1676_s30, %s1428_s6 }
  0x3f   : > { %p1425_p13 = pnand %p1423_p12, %p1409_p3  ;;  %p1431_p10 = scmp.lt.s32.totalorder %s1429_s7, %s1422_s27 }
  0x41   : > { %p1426_p0 = pneg %p1425_p13  ;;  %p1432_p1 = por %p1431_p10, %p1430_p5 }
  0x43   : > { %p1433_p2 = pnand %p1432_p1, %p1426_p0 }
  0x45   : > { %1436 = shalt.err (!%p1433_p2)
}
  0x46   : > { %1075 = dma.hbm_to_vmem [thread:$0]  (!%p1672_p11), %s1670_s25, 128, %s1676_s30, %s175_s9  }
  0x47   : > { %p1941_p7 = scmp.ne.s32.totalorder %s1932_s23, 0 }
  0x48   : > { %s1706_s29 = sand.u32 (!%p1941_p7), 1, %s1499_s16   ;;  %p1942_p3 = scmp.ne.s32.totalorder (!%p1941_p7), %s1930_s21, 0 }
  0x49   : > { %195 = sbr.rel (%p1941_p7) target bundleno = 683 (0x2ab), region = 32  ;;  %s1022_s10 = sshll.u32 (!%p1941_p7), %s1706_s29, 3 }
  0x4a   : > { %s198_s11 = scalar_lea.sflag (!%p1941_p7), [#allocation4], %s1706_s29  ;;  %s201_s12 = scalar_lea.vmem (!%p1941_p7), [#allocation3], %s1022_s10 }
  0x50   : > { %1482 = dma.done.wait (%p1942_p3), %s198_s11, 128  }
  0x51   : > { %1484 = vsyncadd (%p1942_p3), %s198_s11, 4294967168  ;;  %p1943_p4 = scmp.eq.s32.totalorder %s1586_s19, 0 }
  0x53   : > { %1486 = dma.done.wait (%p1943_p4), [#allocation7], 64   ;;  %p1944_p11 = pmov %p1943_p4 }
  0x54   : > { %v239_v0 = vld [vmem:[%s201_s12] sm:$0xff]  ;;  %s1511_s21 = smov 125   ;;  %s1512_s23 = smov 127   ;;  %v1514_v11 = vmov 0.0   ;;  %v1536_v12 = vmov 0   ;;  %vm1537_vm0 = vmmov 0  }
  0x55   : > { %1488 = vsyncadd (%p1944_p11), [#allocation7], 4294967232  ;;  %v1718_v1 = vunpack.c.l.bf16 %v239_v0  ;;  %v241_v2 = vunpack.c.h.bf16 %v239_v0  ;;  %s1513_s25 = smov 126   ;;  %1038 = vmatprep.subr.bf16.mxu1 %v1514_v11  ;;  %684 = vst [vmem:[#allocation2 + $0x120] sm:$0xf0] %v1514_v11  ;;  %s1515_s30 = smov 108   ;;  %801 = vmatprep.mubr.bf16.mxu0 %v1536_v12 }
  0x56   : > { %685 = vst [vmem:[#allocation2 + $0x128] sm:$0xf0] %v1514_v11  ;;  %686 = vst [vmem:[#allocation2 + $0x130] sm:$0xf0] %v1514_v11  ;;  %s1516_s8 = smov 124   ;;  %s1517_s9 = smov 106   ;;  %1054 = vmatprep.mubr.msk.bf16.mxu1 %vm1537_vm0, %v1514_v11 }
  0x57   : > { %v250_v3 = vcombine.low %v241_v2, %v241_v2  ;;  %246 = vst [vmem:[#allocation2] sm:$0xf] %v1718_v1  ;;  %248 = vst [vmem:[#allocation2 + $0x10] sm:$0xf] %v241_v2  ;;  %v249_v4 = vcombine.low %v1718_v1, %v1718_v1  ;;  %v244_v5 = vcombine.high %v1718_v1, %v1718_v1  ;;  %s1518_s13 = smov 107   ;;  %s1519_s14 = smov 104  }
  0x58   : > { %v1734_v9 = vcombine.high %v241_v2, %v241_v2  ;;  %s1520_s28 = smov 105   ;;  %s1521_s27 = smov 87   ;;  %vm296_vm1 = vcmask 1022976   ;;  %vm259_vm2 = vcmask 1039360   ;;  %vm278_vm3 = vcmask 1031168  }
  0x59   : > { %v1726_v6 = vpack.i.bf16 %v250_v3, %v1718_v1  ;;  %247 = vst [vmem:[#allocation2 + $0x8] sm:$0xf] %v244_v5  ;;  %v1730_v7 = vpack.i.bf16 %v241_v2, %v249_v4  ;;  %v1732_v8 = vpack.i.bf16 %v241_v2, %v244_v5  ;;  %s1522_s5 = smov 88   ;;  %s1523_s6 = smov 85   ;;  %vm332_vm4 = vcmask 883712  }
  0x5a   : > { %v1740_v10 = vpack.i.bf16 %v1734_v9, %v1718_v1  ;;  %s1524_s7 = smov 86   ;;  %s1525_s10 = smov 68   ;;  %vm314_vm5 = vcmask 1014784   ;;  %vm368_vm6 = vcmask 867328   ;;  %vm350_vm7 = vcmask 875520  }
  0x5b   : > { %1155 = vrot.lane.b32.xlu1 %v1726_v6, %s1511_s21  ;;  %1145 = vrot.lane.b32.xlu0 %v1726_v6, %s1512_s23  ;;  %s1526_s11 = smov 84   ;;  %s1527_s12 = smov 66   ;;  %vm404_vm8 = vcmask 850944   ;;  %vm386_vm9 = vcmask 859136   ;;  %vm440_vm10 = vcmask 711680   ;;  %vm422_vm11 = vcmask 719872  }
  0x5c   : > { %vm476_vm12 = vcmask 695296   ;;  %vm458_vm13 = vcmask 703488   ;;  %vm512_vm14 = vcmask 556032   ;;  %vm494_vm15 = vcmask 687104  }
  0x5d   : > { %vm548_vm0 = vcmask 539648  }
  0x5f   : > { %1160 = vrot.lane.b32.xlu1 %v1730_v7, %s1512_s23  ;;  %1150 = vrot.lane.b32.xlu0 %v1732_v8, %s1513_s25  ;;  %s1529_s23 = smov 64  }
  0x63   : > { %1170 = vrot.lane.b32.xlu1 %v1730_v7, %s1511_s21  ;;  %1165 = vrot.lane.b32.xlu0 %v1740_v10, %s1513_s25  ;;  %s1528_s21 = smov 67   ;;  %s1530_s25 = smov 65  }
  0x67   : > { %1180 = vrot.lane.b32.xlu1 %v1726_v6, %s1515_s30  ;;  %1175 = vrot.lane.b32.xlu0 %v1732_v8, %s1516_s8 }
  0x6b   : > { %1190 = vrot.lane.b32.xlu1 %v1726_v6, %s1517_s9  ;;  %1185 = vrot.lane.b32.xlu0 %v1732_v8, %s1518_s13 }
  0x6f   : > { %1200 = vrot.lane.b32.xlu1 %v1730_v7, %s1515_s30  ;;  %1195 = vrot.lane.b32.xlu0 %v1740_v10, %s1516_s8  ;;  %s1531_s30 = smov 47   ;;  %s1532_s8 = smov 48  }
  0x73   : > { %1210 = vrot.lane.b32.xlu1 %v1730_v7, %s1517_s9  ;;  %1205 = vrot.lane.b32.xlu0 %v1740_v10, %s1518_s13  ;;  %s1533_s9 = smov 45   ;;  %s1534_s13 = smov 46  }
  0x77   : > { %1220 = vrot.lane.b32.xlu1 %v1726_v6, %s1519_s14  ;;  %1215 = vrot.lane.b32.xlu0 %v1732_v8, %s1520_s28 }
  0x7b   : > { %1230 = vrot.lane.b32.xlu1 %v1726_v6, %s1521_s27  ;;  %1225 = vrot.lane.b32.xlu0 %v1732_v8, %s1522_s5 }
  0x7f   : > { %1240 = vrot.lane.b32.xlu1 %v1730_v7, %s1519_s14  ;;  %1235 = vrot.lane.b32.xlu0 %v1740_v10, %s1520_s28  ;;  %s1535_s14 = smov 44   ;;  %s1058_s28 = smul.u32 24, %s1706_s29 }
  0x83   : > { %1250 = vrot.lane.b32.xlu1 %v1730_v7, %s1521_s27  ;;  %1245 = vrot.lane.b32.xlu0 %v1740_v10, %s1522_s5 }
  0x87   : > { %1260 = vrot.lane.b32.xlu1 %v1726_v6, %s1523_s6  ;;  %1255 = vrot.lane.b32.xlu0 %v1732_v8, %s1524_s7 }
  0x8b   : > { %1270 = vrot.lane.b32.xlu1 %v1726_v6, %s1525_s10  ;;  %1265 = vrot.lane.b32.xlu0 %v1732_v8, %s1526_s11 }
  0x8f   : > { %1280 = vrot.lane.b32.xlu1 %v1730_v7, %s1523_s6  ;;  %1275 = vrot.lane.b32.xlu0 %v1740_v10, %s1524_s7  ;;  %s227_s6 = scalar_lea.vmem [#allocation8], %s1058_s28 }
  0x90   : > { %s907_s7 = sshll.u32 %s227_s6, 4  ;;  %s908_s7 = int_to_ptr.vmem [resolvable:$true] %s907_s7 }
  0x93   : > { %1290 = vrot.lane.b32.xlu1 %v1730_v7, %s1525_s10  ;;  %1285 = vrot.lane.b32.xlu0 %v1740_v10, %s1526_s11  ;;  %s1059_s10 = smul.u32 384, %s1586_s19 }
  0x97   : > { %1300 = vrot.lane.b32.xlu1 %v1726_v6, %s1527_s12  ;;  %1295 = vrot.lane.b32.xlu0 %v1732_v8, %s1528_s21 }
  0x9b   : > { %1310 = vrot.lane.b32.xlu1 %v1726_v6, %s1529_s23  ;;  %1305 = vrot.lane.b32.xlu0 %v1732_v8, %s1530_s25 }
  0x9f   : > { %1320 = vrot.lane.b32.xlu1 %v1730_v7, %s1527_s12  ;;  %1315 = vrot.lane.b32.xlu0 %v1740_v10, %s1528_s21  ;;  %s1879_s21 = scalar_lea.hbm %s1925_s3, %s1059_s10 }
  0xa3   : > { %1330 = vrot.lane.b32.xlu1 %v1730_v7, %s1529_s23  ;;  %1325 = vrot.lane.b32.xlu0 %v1740_v10, %s1530_s25  ;;  %s889_s23 = scalar_lea.sflag [#allocation5], %s1706_s29  ;;  %s1437_s25 = scalar_lea.vmem %s908_s7, 384 }
  0xa4   : > { %p1438_p6 = scmp.ne.s32.totalorder %s908_s7, %s1437_s25 }
  0xa6   : > { %p1439_p9 = pnand %p1438_p6, %p1657_p8 }
  0xa7   : > { %1340 = vrot.lane.b32.xlu1 %v1726_v6, %s1531_s30  ;;  %1335 = vrot.lane.b32.xlu0 %v1732_v8, %s1532_s8 }
  0xa8   : > { %p1440_p12 = pneg %p1439_p9 }
  0xab   : > { %1350 = vrot.lane.b32.xlu1 %v1726_v6, %s1533_s9  ;;  %1345 = vrot.lane.b32.xlu0 %v1732_v8, %s1534_s13 }
  0xaf   : > { %1360 = vrot.lane.b32.xlu1 %v1730_v7, %s1531_s30  ;;  %1355 = vrot.lane.b32.xlu0 %v1740_v10, %s1532_s8  ;;  %s1539_s30 = smov [#allocation8]  }
  0xb0   : > { %s1441_s8 = sshll.u32 %s1539_s30, 4  ;;  %s1442_s8 = int_to_ptr.vmem [resolvable:$false] %s1441_s8 }
  0xb1   : > { %p1444_p13 = scmp.lt.s32.totalorder %s908_s7, %s1442_s8 }
  0xb3   : > { %1370 = vrot.lane.b32.xlu1 %v1730_v7, %s1533_s9  ;;  %1365 = vrot.lane.b32.xlu0 %v1740_v10, %s1534_s13  ;;  %s1443_s9 = scalar_lea.vmem %s1442_s8, 768 }
  0xb4   : > { %p1445_p0 = scmp.lt.s32.totalorder %s1443_s9, %s1437_s25 }
  0xb6   : > { %p1446_p5 = por %p1445_p0, %p1444_p13 }
  0xb7   : > { %1375 = vrot.lane.b32.xlu0 %v1732_v8, %s1535_s14  ;;  %666 = vrot.lane.b32.xlu1 %v1718_v1, %s1535_s14 }
  0xb8   : > { %p1447_p10 = pnand %p1446_p5, %p1440_p12 }
  0xbb   : > { %672 = vrot.lane.b32.xlu0 %v1734_v9, %s1535_s14 }
  0xcd   : > { %v1156_v13 = vpop.permute.xlu1 %1155  ;;  %v1146_v14 = vpop.permute.xlu0 %1145 }
  0xce   : > { %v1158_v15 = vunpack.i.h.bf16 %v1156_v13  ;;  %v1157_v16 = vunpack.i.l.bf16 %v1156_v13  ;;  %v1148_v17 = vunpack.i.h.bf16 %v1146_v14  ;;  %v1147_v18 = vunpack.i.l.bf16 %v1146_v14 }
  0xd0   : > { %v298_v19 = vsel %vm296_vm1, %v1157_v16, %v1158_v15  ;;  %v261_v20 = vsel %vm259_vm2, %v1147_v18, %v1148_v17 }
  0xd1   : > { %304 = vst [vmem:[#allocation2 + $0x20] sm:$0xf0] %v298_v19  ;;  %267 = vst [vmem:[#allocation2 + $0x8] sm:$0xf0] %v261_v20  ;;  %v1161_v21 = vpop.permute.xlu1 %1160  ;;  %v1151_v22 = vpop.permute.xlu0 %1150 }
  0xd2   : > { %v1163_v23 = vunpack.i.h.bf16 %v1161_v21  ;;  %v1162_v24 = vunpack.i.l.bf16 %v1161_v21  ;;  %v1153_v25 = vunpack.i.h.bf16 %v1151_v22  ;;  %v1152_v26 = vunpack.i.l.bf16 %v1151_v22 }
  0xd4   : > { %v262_v27 = vsel %vm259_vm2, %v1148_v17, %v1163_v23  ;;  %v260_v28 = vsel %vm259_vm2, %v1162_v24, %v1147_v18  ;;  %v280_v29 = vsel %vm278_vm3, %v1152_v26, %v1153_v25  ;;  %vm584_vm2 = vcmask 523264  }
  0xd5   : > { %268 = vst [vmem:[#allocation2 + $0x10] sm:$0xf0] %v262_v27  ;;  %266 = vst [vmem:[#allocation2] sm:$0xf0] %v260_v28  ;;  %v1171_v30 = vpop.permute.xlu1 %1170  ;;  %v1166_v31 = vpop.permute.xlu0 %1165 }
  0xd6   : > { %286 = vst [vmem:[#allocation2 + $0x20] sm:$0xf] %v280_v29  ;;  %v1173_v32 = vunpack.i.h.bf16 %v1171_v30  ;;  %v1172_v33 = vunpack.i.l.bf16 %v1171_v30  ;;  %v1168_v34 = vunpack.i.h.bf16 %v1166_v31  ;;  %v1167_v35 = vunpack.i.l.bf16 %v1166_v31 }
  0xd8   : > { %v299_v36 = vsel %vm296_vm1, %v1158_v15, %v1173_v32  ;;  %v297_v37 = vsel %vm296_vm1, %v1172_v33, %v1157_v16  ;;  %v279_v38 = vsel %vm278_vm3, %v1167_v35, %v1152_v26  ;;  %v281_v39 = vsel %vm278_vm3, %v1153_v25, %v1168_v34  ;;  %v698_v48 = vld [vmem:[#allocation2 + $0x8] sm:$0xff] }
  0xd9   : > { %305 = vst [vmem:[#allocation2 + $0x28] sm:$0xf0] %v299_v36  ;;  %303 = vst [vmem:[#allocation2 + $0x18] sm:$0xf0] %v297_v37  ;;  %v1181_v40 = vpop.permute.xlu1 %1180  ;;  %v1176_v41 = vpop.permute.xlu0 %1175  ;;  %vm530_vm1 = vcmask 547840   ;;  %vm566_vm3 = vcmask 531456  }
  0xda   : > { %285 = vst [vmem:[#allocation2 + $0x18] sm:$0xf] %v279_v38  ;;  %287 = vst [vmem:[#allocation2 + $0x28] sm:$0xf] %v281_v39  ;;  %v1183_v42 = vunpack.i.h.bf16 %v1181_v40  ;;  %v1182_v43 = vunpack.i.l.bf16 %v1181_v40  ;;  %v1178_v44 = vunpack.i.h.bf16 %v1176_v41  ;;  %v1177_v45 = vunpack.i.l.bf16 %v1176_v41 }
  0xdc   : > { %v334_v46 = vsel %vm332_vm4, %v1182_v43, %v1183_v42  ;;  %v316_v47 = vsel %vm314_vm5, %v1177_v45, %v1178_v44  ;;  %v697_v57 = vld [vmem:[#allocation2] sm:$0xff]  ;;  %v699_v61 = vld [vmem:[#allocation2 + $0x10] sm:$0xff] }
  0xdd   : > { %v701_v49 = vld [vmem:[#allocation2 + $0x20] sm:$0xff]  ;;  %340 = vst [vmem:[#allocation2 + $0x38] sm:$0xf0] %v334_v46  ;;  %322 = vst [vmem:[#allocation2 + $0x38] sm:$0xf] %v316_v47  ;;  %v1191_v50 = vpop.permute.xlu1 %1190  ;;  %v1186_v51 = vpop.permute.xlu0 %1185 }
  0xde   : > { %v746_v52 = vpack.c.bf16 %v701_v49, %v698_v48  ;;  %v1193_v53 = vunpack.i.h.bf16 %v1191_v50  ;;  %v1192_v54 = vunpack.i.l.bf16 %v1191_v50  ;;  %v1188_v55 = vunpack.i.h.bf16 %v1186_v51 }
  0xdf   : > { %v1187_v56 = vunpack.i.l.bf16 %v1186_v51 }
  0xe0   : > { %769 = vmatprep.subr.bf16.mxu0 %v746_v52  ;;  %v370_v58 = vsel %vm368_vm6, %v1192_v54, %v1193_v53 }
  0xe1   : > { %v352_v59 = vsel %vm350_vm7, %v1187_v56, %v1188_v55  ;;  %v700_v60 = vld [vmem:[#allocation2 + $0x18] sm:$0xff]  ;;  %v702_v62 = vld [vmem:[#allocation2 + $0x28] sm:$0xff]  ;;  %376 = vst [vmem:[#allocation2 + $0x50] sm:$0xf0] %v370_v58  ;;  %v1201_v63 = vpop.permute.xlu1 %1200  ;;  %v1196_v0 = vpop.permute.xlu0 %1195 }
  0xe2   : > { %358 = vst [vmem:[#allocation2 + $0x50] sm:$0xf] %v352_v59  ;;  %v745_v1 = vpack.c.bf16 %v700_v60, %v697_v57  ;;  %v747_v2 = vpack.c.bf16 %v702_v62, %v699_v61  ;;  %v1203_v3 = vunpack.i.h.bf16 %v1201_v63  ;;  %v1202_v4 = vunpack.i.l.bf16 %v1201_v63 }
  0xe3   : > { %v1198_v5 = vunpack.i.h.bf16 %v1196_v0  ;;  %v1197_v6 = vunpack.i.l.bf16 %v1196_v0 }
  0xe4   : > { %770 = vmatpush1.bf16.msra.mxu0 %v745_v1  ;;  %1039 = vmatpush3.bf16.msra.mxu1 %v747_v2  ;;  %v333_v7 = vsel %vm332_vm4, %v1202_v4, %v1182_v43  ;;  %v335_v8 = vsel %vm332_vm4, %v1183_v42, %v1203_v3  ;;  %v704_v22 = vld [vmem:[#allocation2 + $0x38] sm:$0xff]  ;;  %vm620_vm4 = vcmask 384000  }
  0xe5   : > { %v315_v9 = vsel %vm314_vm5, %v1197_v6, %v1177_v45  ;;  %v317_v10 = vsel %vm314_vm5, %v1178_v44, %v1198_v5  ;;  %1040 = vmatprep.subr.bf16.mxu1 %v1514_v11  ;;  %339 = vst [vmem:[#allocation2 + $0x30] sm:$0xf0] %v333_v7  ;;  %341 = vst [vmem:[#allocation2 + $0x40] sm:$0xf0] %v335_v8  ;;  %v1211_v12 = vpop.permute.xlu1 %1210  ;;  %v1206_v13 = vpop.permute.xlu0 %1205  ;;  %vm602_vm5 = vcmask 392192  }
  0xe6   : > { %321 = vst [vmem:[#allocation2 + $0x30] sm:$0xf] %v315_v9  ;;  %323 = vst [vmem:[#allocation2 + $0x40] sm:$0xf] %v317_v10  ;;  %v1213_v14 = vunpack.i.h.bf16 %v1211_v12  ;;  %v1212_v15 = vunpack.i.l.bf16 %v1211_v12  ;;  %v1208_v16 = vunpack.i.h.bf16 %v1206_v13  ;;  %v1207_v17 = vunpack.i.l.bf16 %v1206_v13 }
  0xe8   : > { %v369_v18 = vsel %vm368_vm6, %v1212_v15, %v1192_v54  ;;  %v371_v19 = vsel %vm368_vm6, %v1193_v53, %v1213_v14  ;;  %v351_v20 = vsel %vm350_vm7, %v1207_v17, %v1187_v56  ;;  %v353_v21 = vsel %vm350_vm7, %v1188_v55, %v1208_v16 }
  0xe9   : > { %v707_v23 = vld [vmem:[#allocation2 + $0x50] sm:$0xff]  ;;  %375 = vst [vmem:[#allocation2 + $0x48] sm:$0xf0] %v369_v18  ;;  %377 = vst [vmem:[#allocation2 + $0x58] sm:$0xf0] %v371_v19  ;;  %v1221_v24 = vpop.permute.xlu1 %1220  ;;  %v1216_v25 = vpop.permute.xlu0 %1215  ;;  %vm656_vm6 = vcmask 367616  }
  0xea   : > { %357 = vst [vmem:[#allocation2 + $0x48] sm:$0xf] %v351_v20  ;;  %359 = vst [vmem:[#allocation2 + $0x58] sm:$0xf] %v353_v21  ;;  %v749_v26 = vpack.c.bf16 %v707_v23, %v704_v22  ;;  %v1223_v27 = vunpack.i.h.bf16 %v1221_v24  ;;  %v1222_v28 = vunpack.i.l.bf16 %v1221_v24  ;;  %v1218_v29 = vunpack.i.h.bf16 %v1216_v25 }
  0xeb   : > { %v1217_v30 = vunpack.i.l.bf16 %v1216_v25  ;;  %vm638_vm7 = vcmask 375808  }
  0xec   : > { %771 = vmatprep.subr.bf16.mxu0 %v749_v26  ;;  %v406_v31 = vsel %vm404_vm8, %v1222_v28, %v1223_v27 }
  0xed   : > { %v388_v32 = vsel %vm386_vm9, %v1217_v30, %v1218_v29  ;;  %412 = vst [vmem:[#allocation2 + $0x68] sm:$0xf0] %v406_v31  ;;  %v1231_v33 = vpop.permute.xlu1 %1230  ;;  %v1226_v34 = vpop.permute.xlu0 %1225  ;;  %v703_v39 = vld [vmem:[#allocation2 + $0x30] sm:$0xff]  ;;  %v705_v43 = vld [vmem:[#allocation2 + $0x40] sm:$0xff] }
  0xee   : > { %394 = vst [vmem:[#allocation2 + $0x68] sm:$0xf] %v388_v32  ;;  %v1233_v35 = vunpack.i.h.bf16 %v1231_v33  ;;  %v1232_v36 = vunpack.i.l.bf16 %v1231_v33  ;;  %v1228_v37 = vunpack.i.h.bf16 %v1226_v34  ;;  %v1227_v38 = vunpack.i.l.bf16 %v1226_v34 }
  0xf0   : > { %v442_v40 = vsel %vm440_vm10, %v1232_v36, %v1233_v35  ;;  %v424_v41 = vsel %vm422_vm11, %v1227_v38, %v1228_v37 }
  0xf1   : > { %v706_v42 = vld [vmem:[#allocation2 + $0x48] sm:$0xff]  ;;  %v708_v44 = vld [vmem:[#allocation2 + $0x58] sm:$0xff]  ;;  %448 = vst [vmem:[#allocation2 + $0x80] sm:$0xf0] %v442_v40  ;;  %430 = vst [vmem:[#allocation2 + $0x80] sm:$0xf] %v424_v41  ;;  %v1241_v45 = vpop.permute.xlu1 %1240  ;;  %v1236_v46 = vpop.permute.xlu0 %1235 }
  0xf2   : > { %v748_v47 = vpack.c.bf16 %v706_v42, %v703_v39  ;;  %v750_v48 = vpack.c.bf16 %v708_v44, %v705_v43  ;;  %v1243_v49 = vunpack.i.h.bf16 %v1241_v45  ;;  %v1242_v50 = vunpack.i.l.bf16 %v1241_v45 }
  0xf3   : > { %v1238_v51 = vunpack.i.h.bf16 %v1236_v46  ;;  %v1237_v52 = vunpack.i.l.bf16 %v1236_v46 }
  0xf4   : > { %772 = vmatpush1.bf16.msra.mxu0 %v748_v47  ;;  %1041 = vmatpush3.bf16.msra.mxu1 %v750_v48  ;;  %v405_v53 = vsel %vm404_vm8, %v1242_v50, %v1222_v28  ;;  %v407_v54 = vsel %vm404_vm8, %v1223_v27, %v1243_v49  ;;  %vm674_vm8 = vcmask 359424  }
  0xf5   : > { %v387_v55 = vsel %vm386_vm9, %v1237_v52, %v1217_v30  ;;  %v389_v56 = vsel %vm386_vm9, %v1218_v29, %v1238_v51  ;;  %1042 = vmatprep.subr.bf16.mxu1 %v1514_v11  ;;  %411 = vst [vmem:[#allocation2 + $0x60] sm:$0xf0] %v405_v53  ;;  %413 = vst [vmem:[#allocation2 + $0x70] sm:$0xf0] %v407_v54  ;;  %v1251_v57 = vpop.permute.xlu1 %1250  ;;  %v1246_v58 = vpop.permute.xlu0 %1245  ;;  %v710_v3 = vld [vmem:[#allocation2 + $0x68] sm:$0xff] }
  0xf6   : > { %393 = vst [vmem:[#allocation2 + $0x60] sm:$0xf] %v387_v55  ;;  %395 = vst [vmem:[#allocation2 + $0x70] sm:$0xf] %v389_v56  ;;  %v1253_v59 = vunpack.i.h.bf16 %v1251_v57  ;;  %v1252_v60 = vunpack.i.l.bf16 %v1251_v57  ;;  %v1248_v61 = vunpack.i.h.bf16 %v1246_v58  ;;  %v1247_v62 = vunpack.i.l.bf16 %v1246_v58 }
  0xf8   : > { %v441_v63 = vsel %vm440_vm10, %v1252_v60, %v1232_v36  ;;  %v443_v0 = vsel %vm440_vm10, %v1233_v35, %v1253_v59  ;;  %v423_v1 = vsel %vm422_vm11, %v1247_v62, %v1227_v38  ;;  %v425_v2 = vsel %vm422_vm11, %v1228_v37, %v1248_v61  ;;  %v713_v4 = vld [vmem:[#allocation2 + $0x80] sm:$0xff] }
  0xf9   : > { %447 = vst [vmem:[#allocation2 + $0x78] sm:$0xf0] %v441_v63  ;;  %449 = vst [vmem:[#allocation2 + $0x88] sm:$0xf0] %v443_v0  ;;  %v1261_v5 = vpop.permute.xlu1 %1260  ;;  %v1256_v6 = vpop.permute.xlu0 %1255  ;;  %v752_v7 = vpack.c.bf16 %v713_v4, %v710_v3 }
  0xfa   : > { %429 = vst [vmem:[#allocation2 + $0x78] sm:$0xf] %v423_v1  ;;  %431 = vst [vmem:[#allocation2 + $0x88] sm:$0xf] %v425_v2  ;;  %v1263_v8 = vunpack.i.h.bf16 %v1261_v5  ;;  %v1262_v9 = vunpack.i.l.bf16 %v1261_v5  ;;  %v1258_v10 = vunpack.i.h.bf16 %v1256_v6  ;;  %v1257_v12 = vunpack.i.l.bf16 %v1256_v6 }
  0xfb   : > { %773 = vmatprep.subr.bf16.mxu0 %v752_v7 }
  0xfc   : > { %v478_v13 = vsel %vm476_vm12, %v1262_v9, %v1263_v8  ;;  %v460_v14 = vsel %vm458_vm13, %v1257_v12, %v1258_v10 }
  0xfd   : > { %484 = vst [vmem:[#allocation2 + $0x98] sm:$0xf0] %v478_v13  ;;  %466 = vst [vmem:[#allocation2 + $0x98] sm:$0xf] %v460_v14  ;;  %v1271_v15 = vpop.permute.xlu1 %1270  ;;  %v1266_v16 = vpop.permute.xlu0 %1265  ;;  %v709_v21 = vld [vmem:[#allocation2 + $0x60] sm:$0xff]  ;;  %v711_v25 = vld [vmem:[#allocation2 + $0x70] sm:$0xff] }
  0xfe   : > { %v1273_v17 = vunpack.i.h.bf16 %v1271_v15  ;;  %v1272_v18 = vunpack.i.l.bf16 %v1271_v15  ;;  %v1268_v19 = vunpack.i.h.bf16 %v1266_v16  ;;  %v1267_v20 = vunpack.i.l.bf16 %v1266_v16 }
 0x100   : > { %v514_v22 = vsel %vm512_vm14, %v1272_v18, %v1273_v17  ;;  %v496_v23 = vsel %vm494_vm15, %v1267_v20, %v1268_v19 }
 0x101   : > { %v712_v24 = vld [vmem:[#allocation2 + $0x78] sm:$0xff]  ;;  %v714_v26 = vld [vmem:[#allocation2 + $0x88] sm:$0xff]  ;;  %520 = vst [vmem:[#allocation2 + $0xb0] sm:$0xf0] %v514_v22  ;;  %502 = vst [vmem:[#allocation2 + $0xb0] sm:$0xf] %v496_v23  ;;  %v1281_v27 = vpop.permute.xlu1 %1280  ;;  %v1276_v28 = vpop.permute.xlu0 %1275 }
 0x102   : > { %v751_v29 = vpack.c.bf16 %v712_v24, %v709_v21  ;;  %v753_v30 = vpack.c.bf16 %v714_v26, %v711_v25  ;;  %v1283_v31 = vunpack.i.h.bf16 %v1281_v27  ;;  %v1282_v32 = vunpack.i.l.bf16 %v1281_v27 }
 0x103   : > { %v1278_v33 = vunpack.i.h.bf16 %v1276_v28  ;;  %v1277_v34 = vunpack.i.l.bf16 %v1276_v28 }
 0x104   : > { %774 = vmatpush1.bf16.msra.mxu0 %v751_v29  ;;  %1043 = vmatpush3.bf16.msra.mxu1 %v753_v30  ;;  %v477_v35 = vsel %vm476_vm12, %v1282_v32, %v1262_v9  ;;  %v479_v36 = vsel %vm476_vm12, %v1263_v8, %v1283_v31  ;;  %v716_v49 = vld [vmem:[#allocation2 + $0x98] sm:$0xff] }
 0x105   : > { %v459_v37 = vsel %vm458_vm13, %v1277_v34, %v1257_v12  ;;  %v461_v38 = vsel %vm458_vm13, %v1258_v10, %v1278_v33  ;;  %1044 = vmatprep.subr.bf16.mxu1 %v1514_v11  ;;  %483 = vst [vmem:[#allocation2 + $0x90] sm:$0xf0] %v477_v35  ;;  %485 = vst [vmem:[#allocation2 + $0xa0] sm:$0xf0] %v479_v36  ;;  %v1291_v39 = vpop.permute.xlu1 %1290  ;;  %v1286_v40 = vpop.permute.xlu0 %1285 }
 0x106   : > { %465 = vst [vmem:[#allocation2 + $0x90] sm:$0xf] %v459_v37  ;;  %467 = vst [vmem:[#allocation2 + $0xa0] sm:$0xf] %v461_v38  ;;  %v1293_v41 = vunpack.i.h.bf16 %v1291_v39  ;;  %v1292_v42 = vunpack.i.l.bf16 %v1291_v39  ;;  %v1288_v43 = vunpack.i.h.bf16 %v1286_v40  ;;  %v1287_v44 = vunpack.i.l.bf16 %v1286_v40 }
 0x108   : > { %v513_v45 = vsel %vm512_vm14, %v1292_v42, %v1272_v18  ;;  %v515_v46 = vsel %vm512_vm14, %v1273_v17, %v1293_v41  ;;  %v495_v47 = vsel %vm494_vm15, %v1287_v44, %v1267_v20  ;;  %v497_v48 = vsel %vm494_vm15, %v1268_v19, %v1288_v43  ;;  %v719_v50 = vld [vmem:[#allocation2 + $0xb0] sm:$0xff] }
 0x109   : > { %519 = vst [vmem:[#allocation2 + $0xa8] sm:$0xf0] %v513_v45  ;;  %521 = vst [vmem:[#allocation2 + $0xb8] sm:$0xf0] %v515_v46  ;;  %v1301_v51 = vpop.permute.xlu1 %1300  ;;  %v1296_v52 = vpop.permute.xlu0 %1295  ;;  %v755_v53 = vpack.c.bf16 %v719_v50, %v716_v49 }
 0x10a   : > { %501 = vst [vmem:[#allocation2 + $0xa8] sm:$0xf] %v495_v47  ;;  %503 = vst [vmem:[#allocation2 + $0xb8] sm:$0xf] %v497_v48  ;;  %v1303_v54 = vunpack.i.h.bf16 %v1301_v51  ;;  %v1302_v55 = vunpack.i.l.bf16 %v1301_v51  ;;  %v1298_v56 = vunpack.i.h.bf16 %v1296_v52  ;;  %v1297_v57 = vunpack.i.l.bf16 %v1296_v52 }
 0x10b   : > { %775 = vmatprep.subr.bf16.mxu0 %v755_v53 }
 0x10c   : > { %v550_v58 = vsel %vm548_vm0, %v1302_v55, %v1303_v54  ;;  %v532_v59 = vsel %vm530_vm1, %v1297_v57, %v1298_v56 }
 0x10d   : > { %556 = vst [vmem:[#allocation2 + $0xc8] sm:$0xf0] %v550_v58  ;;  %538 = vst [vmem:[#allocation2 + $0xc8] sm:$0xf] %v532_v59  ;;  %v1311_v60 = vpop.permute.xlu1 %1310  ;;  %v1306_v61 = vpop.permute.xlu0 %1305  ;;  %v715_v2 = vld [vmem:[#allocation2 + $0x90] sm:$0xff]  ;;  %v717_v6 = vld [vmem:[#allocation2 + $0xa0] sm:$0xff] }
 0x10e   : > { %v1313_v62 = vunpack.i.h.bf16 %v1311_v60  ;;  %v1312_v63 = vunpack.i.l.bf16 %v1311_v60  ;;  %v1308_v0 = vunpack.i.h.bf16 %v1306_v61  ;;  %v1307_v1 = vunpack.i.l.bf16 %v1306_v61 }
 0x110   : > { %v586_v3 = vsel %vm584_vm2, %v1312_v63, %v1313_v62  ;;  %v568_v4 = vsel %vm566_vm3, %v1307_v1, %v1308_v0 }
 0x111   : > { %v718_v5 = vld [vmem:[#allocation2 + $0xa8] sm:$0xff]  ;;  %v720_v7 = vld [vmem:[#allocation2 + $0xb8] sm:$0xff]  ;;  %592 = vst [vmem:[#allocation2 + $0xe0] sm:$0xf0] %v586_v3  ;;  %574 = vst [vmem:[#allocation2 + $0xe0] sm:$0xf] %v568_v4  ;;  %v1321_v8 = vpop.permute.xlu1 %1320  ;;  %v1316_v9 = vpop.permute.xlu0 %1315 }
 0x112   : > { %v754_v10 = vpack.c.bf16 %v718_v5, %v715_v2  ;;  %v756_v12 = vpack.c.bf16 %v720_v7, %v717_v6  ;;  %v1323_v13 = vunpack.i.h.bf16 %v1321_v8  ;;  %v1322_v14 = vunpack.i.l.bf16 %v1321_v8 }
 0x113   : > { %v1318_v15 = vunpack.i.h.bf16 %v1316_v9  ;;  %v1317_v16 = vunpack.i.l.bf16 %v1316_v9 }
 0x114   : > { %776 = vmatpush1.bf16.msra.mxu0 %v754_v10  ;;  %1045 = vmatpush3.bf16.msra.mxu1 %v756_v12  ;;  %v549_v17 = vsel %vm548_vm0, %v1322_v14, %v1302_v55  ;;  %v551_v18 = vsel %vm548_vm0, %v1303_v54, %v1323_v13  ;;  %v722_v31 = vld [vmem:[#allocation2 + $0xc8] sm:$0xff] }
 0x115   : > { %v531_v19 = vsel %vm530_vm1, %v1317_v16, %v1297_v57  ;;  %v533_v20 = vsel %vm530_vm1, %v1298_v56, %v1318_v15  ;;  %1046 = vmatprep.subr.bf16.mxu1 %v1514_v11  ;;  %555 = vst [vmem:[#allocation2 + $0xc0] sm:$0xf0] %v549_v17  ;;  %557 = vst [vmem:[#allocation2 + $0xd0] sm:$0xf0] %v551_v18  ;;  %v1331_v21 = vpop.permute.xlu1 %1330  ;;  %v1326_v22 = vpop.permute.xlu0 %1325 }
 0x116   : > { %537 = vst [vmem:[#allocation2 + $0xc0] sm:$0xf] %v531_v19  ;;  %539 = vst [vmem:[#allocation2 + $0xd0] sm:$0xf] %v533_v20  ;;  %v1333_v23 = vunpack.i.h.bf16 %v1331_v21  ;;  %v1332_v24 = vunpack.i.l.bf16 %v1331_v21  ;;  %v1328_v25 = vunpack.i.h.bf16 %v1326_v22  ;;  %v1327_v26 = vunpack.i.l.bf16 %v1326_v22 }
 0x118   : > { %v585_v27 = vsel %vm584_vm2, %v1332_v24, %v1312_v63  ;;  %v587_v28 = vsel %vm584_vm2, %v1313_v62, %v1333_v23  ;;  %v567_v29 = vsel %vm566_vm3, %v1327_v26, %v1307_v1  ;;  %v569_v30 = vsel %vm566_vm3, %v1308_v0, %v1328_v25  ;;  %v725_v32 = vld [vmem:[#allocation2 + $0xe0] sm:$0xff] }
 0x119   : > { %591 = vst [vmem:[#allocation2 + $0xd8] sm:$0xf0] %v585_v27  ;;  %593 = vst [vmem:[#allocation2 + $0xe8] sm:$0xf0] %v587_v28  ;;  %v1341_v33 = vpop.permute.xlu1 %1340  ;;  %v1336_v34 = vpop.permute.xlu0 %1335  ;;  %v758_v35 = vpack.c.bf16 %v725_v32, %v722_v31 }
 0x11a   : > { %573 = vst [vmem:[#allocation2 + $0xd8] sm:$0xf] %v567_v29  ;;  %575 = vst [vmem:[#allocation2 + $0xe8] sm:$0xf] %v569_v30  ;;  %v1343_v36 = vunpack.i.h.bf16 %v1341_v33  ;;  %v1342_v37 = vunpack.i.l.bf16 %v1341_v33  ;;  %v1338_v38 = vunpack.i.h.bf16 %v1336_v34  ;;  %v1337_v39 = vunpack.i.l.bf16 %v1336_v34 }
 0x11b   : > { %777 = vmatprep.subr.bf16.mxu0 %v758_v35 }
 0x11c   : > { %v622_v40 = vsel %vm620_vm4, %v1342_v37, %v1343_v36  ;;  %v604_v41 = vsel %vm602_vm5, %v1337_v39, %v1338_v38 }
 0x11d   : > { %628 = vst [vmem:[#allocation2 + $0xf8] sm:$0xf0] %v622_v40  ;;  %610 = vst [vmem:[#allocation2 + $0xf8] sm:$0xf] %v604_v41  ;;  %v1351_v42 = vpop.permute.xlu1 %1350  ;;  %v1346_v43 = vpop.permute.xlu0 %1345  ;;  %v721_v48 = vld [vmem:[#allocation2 + $0xc0] sm:$0xff]  ;;  %v723_v52 = vld [vmem:[#allocation2 + $0xd0] sm:$0xff] }
 0x11e   : > { %v1353_v44 = vunpack.i.h.bf16 %v1351_v42  ;;  %v1352_v45 = vunpack.i.l.bf16 %v1351_v42  ;;  %v1348_v46 = vunpack.i.h.bf16 %v1346_v43  ;;  %v1347_v47 = vunpack.i.l.bf16 %v1346_v43  ;;  %v850_v41 = vld [vmem:[%s1924_s2] sm:$0x7] }
 0x120   : > { %v658_v49 = vsel %vm656_vm6, %v1352_v45, %v1353_v44  ;;  %v640_v50 = vsel %vm638_vm7, %v1347_v47, %v1348_v46 }
 0x121   : > { %v724_v51 = vld [vmem:[#allocation2 + $0xd8] sm:$0xff]  ;;  %v726_v53 = vld [vmem:[#allocation2 + $0xe8] sm:$0xff]  ;;  %664 = vst [vmem:[#allocation2 + $0x110] sm:$0xf0] %v658_v49  ;;  %646 = vst [vmem:[#allocation2 + $0x110] sm:$0xf] %v640_v50  ;;  %v1361_v54 = vpop.permute.xlu1 %1360  ;;  %v1356_v55 = vpop.permute.xlu0 %1355 }
 0x122   : > { %v757_v56 = vpack.c.bf16 %v724_v51, %v721_v48  ;;  %v759_v57 = vpack.c.bf16 %v726_v53, %v723_v52  ;;  %v1363_v58 = vunpack.i.h.bf16 %v1361_v54  ;;  %v1362_v59 = vunpack.i.l.bf16 %v1361_v54 }
 0x123   : > { %v1358_v60 = vunpack.i.h.bf16 %v1356_v55  ;;  %v1357_v61 = vunpack.i.l.bf16 %v1356_v55 }
 0x124   : > { %778 = vmatpush1.bf16.msra.mxu0 %v757_v56  ;;  %1047 = vmatpush3.bf16.msra.mxu1 %v759_v57  ;;  %v621_v62 = vsel %vm620_vm4, %v1362_v59, %v1342_v37  ;;  %v623_v63 = vsel %vm620_vm4, %v1343_v36, %v1363_v58  ;;  %v728_v13 = vld [vmem:[#allocation2 + $0xf8] sm:$0xff]  ;;  %v1538_v36 = vmov 0.0|0.0   ;;  %v696_v37 = vld [vmem:[#allocation6] sm:$0xf] }
 0x125   : > { %v603_v0 = vsel %vm602_vm5, %v1357_v61, %v1337_v39  ;;  %v605_v1 = vsel %vm602_vm5, %v1338_v38, %v1358_v60  ;;  %1048 = vmatprep.subr.bf16.mxu1 %v1514_v11  ;;  %627 = vst [vmem:[#allocation2 + $0xf0] sm:$0xf0] %v621_v62  ;;  %629 = vst [vmem:[#allocation2 + $0x100] sm:$0xf0] %v623_v63  ;;  %v1371_v2 = vpop.permute.xlu1 %1370  ;;  %v1366_v3 = vpop.permute.xlu0 %1365  ;;  %v852_v38 = vlaneseq }
 0x126   : > { %609 = vst [vmem:[#allocation2 + $0xf0] sm:$0xf] %v603_v0  ;;  %611 = vst [vmem:[#allocation2 + $0x100] sm:$0xf] %v605_v1  ;;  %v1373_v4 = vunpack.i.h.bf16 %v1371_v2  ;;  %v1372_v5 = vunpack.i.l.bf16 %v1371_v2  ;;  %v1368_v6 = vunpack.i.h.bf16 %v1366_v3  ;;  %v1367_v7 = vunpack.i.l.bf16 %v1366_v3 }
 0x127   : > { %v853_v39 = vshrl.u32 %v852_v38, 7 }
 0x128   : > { %v657_v8 = vsel %vm656_vm6, %v1372_v5, %v1352_v45  ;;  %v659_v9 = vsel %vm656_vm6, %v1353_v44, %v1373_v4  ;;  %v639_v10 = vsel %vm638_vm7, %v1367_v7, %v1347_v47  ;;  %v641_v12 = vsel %vm638_vm7, %v1348_v46, %v1368_v6  ;;  %v731_v14 = vld [vmem:[#allocation2 + $0x110] sm:$0xff] }
 0x129   : > { %663 = vst [vmem:[#allocation2 + $0x108] sm:$0xf0] %v657_v8  ;;  %665 = vst [vmem:[#allocation2 + $0x118] sm:$0xf0] %v659_v9  ;;  %v1376_v15 = vpop.permute.xlu0 %1375  ;;  %v667_v16 = vpop.permute.xlu1 %666  ;;  %v761_v17 = vpack.c.bf16 %v731_v14, %v728_v13  ;;  %v854_v40 = vsub.s32 0, %v853_v39  ;;  %v858_v42 = vsub.s32 1, %v853_v39 }
 0x12a   : > { %645 = vst [vmem:[#allocation2 + $0x108] sm:$0xf] %v639_v10  ;;  %647 = vst [vmem:[#allocation2 + $0x118] sm:$0xf] %v641_v12  ;;  %v1378_v18 = vunpack.i.h.bf16 %v1376_v15  ;;  %v1377_v19 = vunpack.i.l.bf16 %v1376_v15  ;;  %v862_v43 = vsub.s32 2, %v853_v39 }
 0x12b   : > { %779 = vmatprep.subr.bf16.mxu0 %v761_v17  ;;  %v855_v44 = vrot.slane %v850_v41, %v854_v40  ;;  %v859_v45 = vrot.slane %v850_v41, %v858_v42 }
 0x12c   : > { %v675_v20 = vsel %vm674_vm8, %v667_v16, %v1377_v19  ;;  %v676_v21 = vsel %vm674_vm8, %v1377_v19, %v1378_v18  ;;  %v863_v46 = vrot.slane %v850_v41, %v862_v43 }
 0x12d   : > { %681 = vst [vmem:[#allocation2 + $0x120] sm:$0xf] %v675_v20  ;;  %682 = vst [vmem:[#allocation2 + $0x128] sm:$0xf] %v676_v21  ;;  %v673_v22 = vpop.permute.xlu0 %672  ;;  %v727_v24 = vld [vmem:[#allocation2 + $0xf0] sm:$0xff]  ;;  %v729_v26 = vld [vmem:[#allocation2 + $0x100] sm:$0xff] }
 0x12e   : > { %v677_v23 = vsel %vm674_vm8, %v1378_v18, %v673_v22 }
 0x12f   : > { %683 = vst [vmem:[#allocation2 + $0x130] sm:$0xf] %v677_v23 }
 0x131   : > { %v730_v25 = vld [vmem:[#allocation2 + $0x108] sm:$0xff]  ;;  %v732_v27 = vld [vmem:[#allocation2 + $0x118] sm:$0xff] }
 0x132   : > { %v760_v28 = vpack.c.bf16 %v730_v25, %v727_v24  ;;  %v762_v29 = vpack.c.bf16 %v732_v27, %v729_v26 }
 0x134   : > { %780 = vmatpush1.bf16.msra.mxu0 %v760_v28  ;;  %1049 = vmatpush3.bf16.msra.mxu1 %v762_v29  ;;  %v734_v30 = vld [vmem:[#allocation2 + $0x128] sm:$0xff]  ;;  %v733_v31 = vld [vmem:[#allocation2 + $0x120] sm:$0xff] }
 0x135   : > { %1050 = vmatprep.subr.bf16.mxu1 %v1514_v11  ;;  %v764_v32 = vpack.c.bf16 %v1514_v11, %v734_v30  ;;  %v763_v33 = vpack.c.bf16 %v1514_v11, %v733_v31 }
 0x136   : > { %v735_v34 = vld [vmem:[#allocation2 + $0x130] sm:$0xff] }
 0x137   : > { %781 = vmatprep.subr.bf16.mxu0 %v764_v32  ;;  %v765_v35 = vpack.c.bf16 %v1514_v11, %v735_v34 }
 0x138   : > { %782 = vmatpush1.bf16.msra.mxu0 %v763_v33 }
 0x139   : > { %1051 = vmatpush3.bf16.msra.mxu1 %v765_v35  ;;  %783 = vmatprep.subr.bf16.mxu0 %v1538_v36 }
 0x13a   : > { %1052 = vmatprep.subr.bf16.mxu1 %v1514_v11 }
 0x13c   : > { %784 = vmatpush1.bf16.msra.mxu0 %v1538_v36 }
 0x13d   : > { %1053 = vmatpush3.bf16.msra.mxu1 %v1538_v36 }
 0x13f   : > { %802 = vmatmul.mubr.bf16.vlgmr.msra.gmra.mrb[0].mxu0 %v696_v37 }
 0x140   : > { %1055 = vmatmul.mubr.bf16.vlgmr.msra.gmra.mrb[0].mxu1 %v696_v37 }
 0x212   : > { %v803_v47 = vpop.f32.mrb[0].mxu0 }
 0x213   : > { %v867_v11 = vmul.f32 %v855_v44, %v803_v47  ;;  %885 = vst [vmem:[%s227_s6] sm:$0xff] %v803_v47  ;;  %v805_v48 = vpop.f32.mrb[1].mxu0  ;;  %v844_v49 = vpop.f32.mrb[0].mxu1 }
 0x214   : > { %v868_v50 = vmul.f32 %v859_v45, %v805_v48  ;;  %886 = vst [vmem:[%s227_s6 + $0x8] sm:$0xff] %v805_v48  ;;  %887 = vst [vmem:[%s227_s6 + $0x10] sm:$0xff] %v844_v49  ;;  %v807_v51 = vpop.f32.mrb[2].mxu0  ;;  %v1056_v52 = vpop.f32.mrb[1].mxu1  ;;  %v869_v53 = vmul.f32 %v863_v46, %v844_v49 }
 0x215   : > { %v876_v54 = vmul.f32 %v867_v11, %v803_v47  ;;  %v808_v55 = vpop.f32.mrb[3].mxu0  ;;  %v847_v56 = vpop.f32.mrb[2].mxu1 }
 0x216   : > { %v877_v57 = vmul.f32 %v868_v50, %v805_v48  ;;  %v1057_v58 = vpop.f32.mrb[3].mxu1  ;;  %v870_v59 = vadd.f32 %v868_v50, %v867_v11  ;;  %v878_v61 = vmul.f32 %v869_v53, %v844_v49 }
 0x218   : > { %v871_v60 = vadd.f32 %v870_v59, %v869_v53  ;;  %v879_v62 = vadd.f32 %v877_v57, %v876_v54 }
 0x21a   : > { %872 = vadd.xlane.f32.xlu1 %v871_v60  ;;  %v880_v63 = vadd.f32 %v879_v62, %v878_v61 }
 0x21c   : > { %881 = vadd.xlane.f32.xlu0 %v880_v63 }
 0x21d   : > { %1450 = shalt.err (!%p1447_p10)
}
 0x21e   : > { %s1451_s29 = scalar_lea.hbm %s1879_s21, 384  ;;  %s1455_s28 = scalar_lea.hbm %s1925_s3, 768 }
 0x21f   : > { %p1452_p1 = scmp.ne.s32.totalorder %s1879_s21, %s1451_s29  ;;  %p1456_p3 = scmp.lt.u32.totalorder %s1879_s21, %s1925_s3 }
 0x220   : > { %p1457_p4 = scmp.lt.u32.totalorder %s1455_s28, %s1451_s29  ;;  %p1459_p6 = scmp.lt.u32.totalorder %s1451_s29, %s1879_s21 }
 0x221   : > { %p1453_p2 = pnand %p1452_p1, %p1657_p8 }
 0x222   : > { %p1458_p11 = por %p1457_p4, %p1456_p3 }
 0x223   : > { %p1454_p7 = pneg %p1453_p2 }
 0x224   : > { %p1460_p9 = por %p1459_p6, %p1458_p11 }
 0x226   : > { %p1461_p12 = pnand %p1460_p9, %p1454_p7 }
 0x228   : > { %1464 = shalt.err (!%p1461_p12)
}
 0x229   : > { %1066 = dma.vmem_to_hbm [thread:$0]  (%p1657_p8), %s908_s7, 384, %s1879_s21, %s889_s23   ;;  %vm874_vm9 = vcmask 7168   ;;  %vm883_vm10 = vcmask 15368  }
 0x22a   : > { %p234_p13 = scmp.lt.s32.totalorder %s1586_s19, 1 }
 0x22c   : > { %s1952_s19 = smov (!%p234_p13, %s1586_s19), 1 }
 0x22d   : > { %s1024_s6 = sshll.u32 %s1952_s19, 3 }
 0x22e   : > { %s237_s12 = scalar_lea.vmem %s1926_s4, %s1024_s6 }
 0x2a7   : > { %v873_v0 = vpop.xlane.xlu1 %872 }
 0x2a8   : > { %875 = vst.msk [vmem:[%s237_s12] sm:$0xff] %vm874_vm9, %v873_v0 }
 0x2a9   : > { %v882_v1 = vpop.xlane.xlu0 %881 }
 0x2aa   : > { %884 = vst.msk [vmem:[%s237_s12] sm:$0xff] %vm883_vm10, %v882_v1 }
 0x2ab PF: > { %s922_s24 = sand.u32 1, %s1495_s15   ;;  %p1945_p0 = scmp.ne.s32.totalorder %s1931_s22, 0 }
 0x2ac   : > { %p1946_p8 = scmp.ge.s32.totalorder %s1507_s18, 2  ;;  %s923_s7 = scalar_lea.sflag [#allocation5], %s922_s24 }
 0x2ae   : > { %p1077_p5 = pnand %p1946_p8, %p1945_p0 }
 0x2b0   : > { %1490 = dma.done.wait (!%p1077_p5), %s923_s7, 384  }
 0x2b1   : > { %1492 = vsyncadd (!%p1077_p5), %s923_s7, 4294966912  ;;  %p19_p10 = scmp.ge.s32.totalorder %s1613_s26, 4   ;;  %s1947_s15 = smov %s1499_s16 }
 0x2b2   : > { %s1948_s16 = smov %s1503_s17  ;;  %s1949_s17 = smov %s1649_s20 }
 0x2b3   : > { %s1950_s18 = smov %s1613_s26  ;;  %21 = sbr.rel (!%p19_p10) target bundleno = 6 (0x6), region = 93 }
 0x2ba   :  { %935 = vsyncpa [#allocation4], 1 }
 0x2bb   :  { %937 = vsyncpa [#allocation4 + $0x1], 1 }
 0x2bc   :  { %938 = vsyncpa [#allocation7], 1 }
 0x2bd   :  { %939 = vsyncpa [#allocation5], 1 }
 0x2be   :  { %941 = vsyncpa [#allocation5 + $0x1], 1 }

</bundles_post_ra>
